<compile_context>
chip_gen: v7x
topology: tpu7x:2x2x1
jax: 0.10.0
libtpu: 0.0.40
codegen_flags: <defaults>
</compile_context>

<pallas_src>
import functools

import jax
import jax.numpy as jnp
import numpy as np
from jax import lax
from jax.experimental import pallas as pl
from jax.experimental.pallas import tpu as pltpu

_LANE = 128
_SUBLANE = 8


def _round_up(x, m):
    return ((x + m - 1) // m) * m


def _layernorm_kernel(x_ref, w_ref, b_ref, o_ref, *, inv_d, eps):
    # x_ref/o_ref: (tb, D); w_ref/b_ref: (1, D), VMEM-resident across steps.
    x = x_ref[...].astype(jnp.float32)                        # (tb, D)
    mean = jnp.sum(x, axis=-1, keepdims=True) * inv_d         # (tb, 1)
    xc = x - mean
    var = jnp.sum(xc * xc, axis=-1, keepdims=True) * inv_d    # biased, as PyTorch
    inv = lax.rsqrt(var + eps)                                 # (tb, 1)
    w = w_ref[...].astype(jnp.float32)                         # (1, D)
    b = b_ref[...].astype(jnp.float32)
    o_ref[...] = (xc * (inv * w) + b).astype(o_ref.dtype)


def _vmem_capacity_bytes():
    try:
        return int(pltpu.get_tpu_info().vmem_capacity_bytes)
    except Exception:
        return 64 * 1024 * 1024  # conservative default (v7x per-core VMEM)


def _per_sample_bytes(D, x_itemsize):
    d_phys = _round_up(D, _LANE)
    # double-buffered input + output tiles, plus ~3 f32 tile-sized temporaries
    # (f32 upcast of x, xc, and the broadcast y) live inside the kernel.
    return d_phys * (2 * x_itemsize + 2 * x_itemsize + 3 * 4)


def _resident_param_bytes(D, p_itemsize):
    # weight + bias, constant index_map but still allocated 2 buffers each.
    return 2 * 2 * _round_up(D, _LANE) * p_itemsize


def _pick_batch_tile(B, D, x_itemsize, p_itemsize, vmem_capacity):
    per_sample = _per_sample_bytes(D, x_itemsize)
    resident = _resident_param_bytes(D, p_itemsize)
    budget = max(per_sample * _SUBLANE,
                 int(0.40 * vmem_capacity) - resident)
    max_tb = max(1, budget // per_sample)

    if B <= _SUBLANE:
        # Tiny batch: a single full-dim tile is always sublane-legal and fits.
        return B

    # Aim for >= 2 grid steps (pipeline overlap + v7x dual-TensorCore sharding)
    # and a sublane-legal (multiple-of-8) tile height.
    tb = min(max_tb, (B + 1) // 2)
    tb = max(_SUBLANE, (tb // _SUBLANE) * _SUBLANE)
    return tb


def _vmem_limit_bytes(tb, D, x_itemsize, p_itemsize, vmem_capacity):
    d_phys = _round_up(D, _LANE)
    tb_phys = _round_up(tb, _SUBLANE)
    tiles = 2 * 2 * tb_phys * d_phys * x_itemsize          # in + out, x2 buffers
    temps = 3 * tb_phys * d_phys * 4                        # f32 temporaries
    resident = _resident_param_bytes(D, p_itemsize)
    need = tiles + temps + resident + (2 << 20)
    return int(min(max(need, 32 << 20), int(0.90 * vmem_capacity)))


def mtgnn_layer_norm(x, weight, bias, idx, eps=1e-5):
    """x: (B, C, N, T); weight/bias: (C, N_total, T); idx: (N,) int node indices."""
    orig_shape = x.shape
    B = x.shape[0]
    D = int(np.prod(x.shape[1:]))

    # Glue (cheap, O(D) params, no extra pass over x): gather per-node affine
    # params and view x as (B, D).  Contiguous reshapes are free (no HBM copy).
    w = weight[:, idx, :].reshape(1, D)
    b = bias[:, idx, :].reshape(1, D)
    x2 = x.reshape(B, D)

    x_itemsize = jnp.dtype(x.dtype).itemsize
    p_itemsize = jnp.dtype(weight.dtype).itemsize
    cap = _vmem_capacity_bytes()
    tb = _pick_batch_tile(B, D, x_itemsize, p_itemsize, cap)
    grid = (B + tb - 1) // tb                                # ragged tail is masked
    vmem_limit = _vmem_limit_bytes(tb, D, x_itemsize, p_itemsize, cap)

    out = pl.pallas_call(
        functools.partial(_layernorm_kernel,
                          inv_d=1.0 / float(D),
                          eps=float(eps)),
        out_shape=jax.ShapeDtypeStruct((B, D), x.dtype),
        grid=(grid,),
        in_specs=[
            pl.BlockSpec((tb, D), lambda i: (i, 0)),         # pipelined batch tiles
            pl.BlockSpec((1, D), lambda i: (0, 0)),          # weight: resident
            pl.BlockSpec((1, D), lambda i: (0, 0)),          # bias:   resident
        ],
        out_specs=pl.BlockSpec((tb, D), lambda i: (i, 0)),
        compiler_params=pltpu.CompilerParams(
            dimension_semantics=("parallel",),
            vmem_limit_bytes=vmem_limit,
        ),
    )(x2, w, b)

    return out.reshape(orig_shape)


def _reference(x, weight, bias, idx, eps=1e-5):
    w = weight[:, idx, :]
    b = bias[:, idx, :]
    axes = tuple(range(1, x.ndim))
    mean = jnp.mean(x, axis=axes, keepdims=True)
    var = jnp.mean((x - mean) ** 2, axis=axes, keepdims=True)
    return (x - mean) / jnp.sqrt(var + eps) * w[None] + b[None]


if __name__ == "__main__":
    key = jax.random.PRNGKey(0)
    eps = 1e-5

    C, N_total = 4, 20
    N_sub = 16

    # Two cases: D a multiple of 128 (T=8 -> D=512) and a ragged D (T=7 -> D=448,
    # exercising the masked last-dim path that replaces the old pad/slice glue).
    for T in (8, 7):
        k_x, k_w, k_b, k_idx, key = jax.random.split(key, 5)
        B = 2
        x = jax.random.normal(k_x, (B, C, N_sub, T), dtype=jnp.float32)
        idx = jax.random.permutation(k_idx, N_total)[:N_sub]

        # nn.Module init: weight=ones, bias=zeros over normalized_shape
        # (C, N_total, T). Perturb to exercise the affine path.
        weight = jnp.ones((C, N_total, T), dtype=jnp.float32) \
            + 0.1 * jax.random.normal(k_w, (C, N_total, T), dtype=jnp.float32)
        bias = 0.1 * jax.random.normal(k_b, (C, N_total, T), dtype=jnp.float32)

        out = mtgnn_layer_norm(x, weight, bias, idx, eps=eps)
        out = jax.block_until_ready(out)

        ref = _reference(x, weight, bias, idx, eps=eps)
        np.testing.assert_allclose(np.asarray(out), np.asarray(ref),
                                   atol=1e-5, rtol=1e-5)

    print("KERNEL_OK")
</pallas_src>

<mosaic_0001>
module attributes {stable_mosaic.version = 11 : i64} {
  func.func @_layernorm_kernel(%arg0: i32, %arg1: memref<2x512xf32, #tpu.memory_space<vmem>>, %arg2: memref<1x512xf32, #tpu.memory_space<vmem>>, %arg3: memref<1x512xf32, #tpu.memory_space<vmem>>, %arg4: memref<2x512xf32, #tpu.memory_space<vmem>>) attributes {dimension_semantics = [#tpu.dimension_semantics<parallel>], iteration_bounds = array<i64: 1>, scalar_prefetch = 0 : i64, scratch_operands = 0 : i64, tpu.core_type = #tpu.core_type<tc>, window_params = [{transform_indices = @transform_0, window_bounds = array<i64: 2, 512>}, {pipeline_mode = #tpu.pipeline_mode<synchronous>, transform_indices = @transform_1, window_bounds = array<i64: 1, 512>}, {pipeline_mode = #tpu.pipeline_mode<synchronous>, transform_indices = @transform_2, window_bounds = array<i64: 1, 512>}, {transform_indices = @transform_3, window_bounds = array<i64: 2, 512>}]} {
    %c0 = arith.constant 0 : index
    %c0_0 = arith.constant 0 : index
    %0 = vector.load %arg1[%c0, %c0_0] : memref<2x512xf32, #tpu.memory_space<vmem>>, vector<2x512xf32>
    %cst = arith.constant dense<0.000000e+00> : vector<2xf32>
    %1 = vector.multi_reduction <add>, %0, %cst [1] : vector<2x512xf32> to vector<2xf32>
    %2 = vector.shape_cast %1 : vector<2xf32> to vector<2x1xf32>
    %cst_1 = arith.constant 0.001953125 : f32
    %3 = vector.broadcast %cst_1 : f32 to vector<2x1xf32>
    %4 = arith.mulf %2, %3 : vector<2x1xf32>
    %5 = vector.broadcast %4 : vector<2x1xf32> to vector<2x512xf32>
    %6 = arith.subf %0, %5 : vector<2x512xf32>
    %7 = arith.mulf %6, %6 : vector<2x512xf32>
    %cst_2 = arith.constant dense<0.000000e+00> : vector<2xf32>
    %8 = vector.multi_reduction <add>, %7, %cst_2 [1] : vector<2x512xf32> to vector<2xf32>
    %9 = vector.shape_cast %8 : vector<2xf32> to vector<2x1xf32>
    %cst_3 = arith.constant 0.001953125 : f32
    %10 = vector.broadcast %cst_3 : f32 to vector<2x1xf32>
    %11 = arith.mulf %9, %10 : vector<2x1xf32>
    %cst_4 = arith.constant 9.99999974E-6 : f32
    %12 = vector.broadcast %cst_4 : f32 to vector<2x1xf32>
    %13 = arith.addf %11, %12 : vector<2x1xf32>
    %14 = math.rsqrt %13 : vector<2x1xf32>
    %c0_5 = arith.constant 0 : index
    %c0_6 = arith.constant 0 : index
    %15 = vector.load %arg2[%c0_5, %c0_6] : memref<1x512xf32, #tpu.memory_space<vmem>>, vector<1x512xf32>
    %c0_7 = arith.constant 0 : index
    %c0_8 = arith.constant 0 : index
    %16 = vector.load %arg3[%c0_7, %c0_8] : memref<1x512xf32, #tpu.memory_space<vmem>>, vector<1x512xf32>
    %17 = vector.broadcast %14 : vector<2x1xf32> to vector<2x512xf32>
    %18 = vector.broadcast %15 : vector<1x512xf32> to vector<2x512xf32>
    %19 = arith.mulf %17, %18 : vector<2x512xf32>
    %20 = arith.mulf %6, %19 : vector<2x512xf32>
    %21 = vector.broadcast %16 : vector<1x512xf32> to vector<2x512xf32>
    %22 = arith.addf %20, %21 : vector<2x512xf32>
    %c0_9 = arith.constant 0 : index
    %c0_10 = arith.constant 0 : index
    %23 = vector.load %arg4[%c0_9, %c0_10] : memref<2x512xf32, #tpu.memory_space<vmem>>, vector<2x512xf32>
    tpu.vector_store %arg4[%c0_9, %c0_10], %22 {strides = array<i32>} : memref<2x512xf32, #tpu.memory_space<vmem>>, vector<2x512xf32>,
    return
  }
  func.func @transform_0(%arg0: i32) -> (i32, i32) {
    %c0_i32 = arith.constant 0 : i32
    %c0_i32_0 = arith.constant 0 : i32
    return %arg0, %c0_i32 : i32, i32
  }
  func.func @transform_1(%arg0: i32) -> (i32, i32) {
    %c0_i32 = arith.constant 0 : i32
    %c0_i32_0 = arith.constant 0 : i32
    %c0_i32_1 = arith.constant 0 : i32
    return %c0_i32, %c0_i32_0 : i32, i32
  }
  func.func @transform_2(%arg0: i32) -> (i32, i32) {
    %c0_i32 = arith.constant 0 : i32
    %c0_i32_0 = arith.constant 0 : i32
    %c0_i32_1 = arith.constant 0 : i32
    return %c0_i32, %c0_i32_0 : i32, i32
  }
  func.func @transform_3(%arg0: i32) -> (i32, i32) {
    %c0_i32 = arith.constant 0 : i32
    %c0_i32_0 = arith.constant 0 : i32
    return %arg0, %c0_i32 : i32, i32
  }
}

</mosaic_0001>

<bundles_post_ra>
// kernel: tpu_custom_call.1
= control target key start
LH: loop header
LB: loop body
LE: loop exit
PB: predicated region body
PF: predicated region fallthrough
CT: control target
= control target key end

     0   :  { %8 = vsyncpa [#allocation3], 0  ;;  %s383_s0 = inlined_call_operand.hbm [shape: f32[2,512], index: 0, kind: input, shape index: {}]   ;;  %s384_s1 = inlined_call_operand.hbm [shape: f32[1,512], index: 1, kind: input, shape index: {}]   ;;  %s385_s2 = inlined_call_operand.vmem [shape: f32[1,512], index: 2, kind: input, shape index: {}]   ;;  %s386_s3 = inlined_call_operand.hbm [shape: f32[2,512], index: 3, kind: output, shape index: {}]  }
   0x1   :  { %9 = vsyncpa [#allocation6], 0 }
   0x2   :  { %10 = vsyncpa [#allocation4], 0  ;;  %s301_s12 = smov [#allocation2]   ;;  %s302_s14 = smov [#allocation5]  }
   0x3   :  { %s17_s13 = sshll.u32 %s301_s12, 4  ;;  %s27_s15 = sshll.u32 %s302_s14, 4  ;;  %s18_s13 = int_to_ptr.vmem [resolvable:$true] %s17_s13  ;;  %s28_s15 = int_to_ptr.vmem [resolvable:$true] %s27_s15 }
   0x4   :  { %s229_s18 = scalar_lea.hbm %s383_s0, 128 }
   0x5   :  { %p230_p0 = scmp.ne.s32.totalorder %s383_s0, %s229_s18  ;;  %p233_p1 = scmp.lt.u32.totalorder %s229_s18, %s383_s0 }
   0x7   :  { %p235_p2 = pnand %p233_p1, %p230_p0 }
   0x9   :  { %238 = shalt.err (!%p235_p2)
}
   0xa   :  { %s239_s23 = scalar_lea.vmem %s18_s13, 128  ;;  %p244_p4 = scmp.lt.s32.totalorder %s18_s13, %s18_s13 }
   0xb   :  { %p240_p3 = scmp.ne.s32.totalorder %s18_s13, %s239_s23  ;;  %p245_p5 = scmp.lt.s32.totalorder %s239_s23, %s239_s23 }
   0xd   :  { %p246_p6 = por %p245_p5, %p244_p4 }
   0xf   :  { %p247_p7 = pnand %p246_p6, %p240_p3 }
  0x11   :  { %250 = shalt.err (!%p247_p7)
}
  0x12   :  { %20 = dma.hbm_to_vmem [thread:$0]  %s383_s0, 128, %s18_s13, [#allocation3]  }
  0x13   :  { %s251_s28 = scalar_lea.hbm %s384_s1, 64 }
  0x14   :  { %p252_p8 = scmp.ne.s32.totalorder %s384_s1, %s251_s28  ;;  %p255_p9 = scmp.lt.u32.totalorder %s251_s28, %s384_s1 }
  0x16   :  { %p257_p10 = pnand %p255_p9, %p252_p8 }
  0x18   :  { %260 = shalt.err (!%p257_p10)
}
  0x19   :  { %s261_s6 = scalar_lea.vmem %s28_s15, 64  ;;  %p266_p12 = scmp.lt.s32.totalorder %s28_s15, %s28_s15 }
  0x1a   :  { %p262_p11 = scmp.ne.s32.totalorder %s28_s15, %s261_s6  ;;  %p267_p13 = scmp.lt.s32.totalorder %s261_s6, %s261_s6 }
  0x1c   :  { %p268_p0 = por %p267_p13, %p266_p12 }
  0x1e   :  { %p269_p1 = pnand %p268_p0, %p262_p11 }
  0x20   :  { %272 = shalt.err (!%p269_p1)
}
  0x21   :  { %30 = dma.hbm_to_vmem [thread:$0]  %s384_s1, 64, %s28_s15, [#allocation6]  }
  0x22   :  { %295 = dma.done.wait [#allocation3], 128  }
  0x23   :  { %296 = vsyncadd [#allocation3], 4294967168 }
  0x24   :  { %297 = dma.done.wait [#allocation6], 64  }
  0x25   :  { %298 = vsyncadd [#allocation6], 4294967232  ;;  %v45_v0 = vlaneseq  ;;  %v303_v1 = vmov 1983009808   ;;  %v39_v6 = vld [vmem:[#allocation2] sm:$0xff]  ;;  %vm62_vm0 = vcmask 1041408  }
  0x26   :  { %v43_v2 = vunpack.c.l.s4 %v303_v1  ;;  %v41_v7 = vcombine.high %v39_v6, %v39_v6  ;;  %v304_v19 = vmov 269488144   ;;  %v119_v43 = vld [vmem:[%s385_s2] sm:$0xf]  ;;  %v118_v48 = vld [vmem:[#allocation5] sm:$0xf] }
  0x27   :  { %v46_v3 = vshrl.u32 %v45_v0, 7  ;;  %v75_v20 = vunpack.c.l.s4 %v304_v19  ;;  %s305_s2 = smov [#allocation7]  }
  0x28   :  { %v44_v4 = vunpack.c.0.s8 %v43_v2  ;;  %s211_s9 = sshll.u32 %s305_s2, 4  ;;  %s212_s9 = int_to_ptr.vmem [resolvable:$true] %s211_s9 }
  0x29   :  { %v76_v21 = vunpack.c.0.s8 %v75_v20  ;;  %v123_v44 = vsub.s32 0, %v46_v3  ;;  %v127_v45 = vsub.s32 1, %v46_v3  ;;  %v131_v46 = vsub.s32 2, %v46_v3  ;;  %s273_s10 = scalar_lea.vmem %s212_s9, 128  ;;  %p278_p3 = scmp.lt.s32.totalorder %s212_s9, %s212_s9 }
  0x2a   :  { %v350_v5 = vsub.s32 %v44_v4, %v46_v3  ;;  %v135_v47 = vsub.s32 3, %v46_v3  ;;  %p274_p2 = scmp.ne.s32.totalorder %s212_s9, %s273_s10  ;;  %p279_p4 = scmp.lt.s32.totalorder %s273_s10, %s273_s10 }
  0x2b   :  { %v79_v22 = vsub.s32 %v76_v21, %v46_v3  ;;  %v172_v49 = vrot.slane %v119_v43, %v123_v44  ;;  %v176_v50 = vrot.slane %v119_v43, %v127_v45  ;;  %v180_v51 = vrot.slane %v119_v43, %v131_v46 }
  0x2c   :  { %v48_v8 = vrot.slane %v39_v6, %v350_v5  ;;  %v55_v9 = vrot.slane %v41_v7, %v350_v5  ;;  %v184_v52 = vrot.slane %v119_v43, %v135_v47  ;;  %v124_v53 = vrot.slane %v118_v48, %v123_v44  ;;  %p280_p5 = por %p279_p4, %p278_p3 }
  0x2d   :  { %v128_v54 = vrot.slane %v118_v48, %v127_v45  ;;  %v132_v55 = vrot.slane %v118_v48, %v131_v46  ;;  %v136_v56 = vrot.slane %v118_v48, %v135_v47  ;;  %v185_v57 = vcombine.low %v172_v49, %v176_v50 }
  0x2e   :  { %v56_v10 = vcombine.high %v48_v8, %v48_v8  ;;  %v63_v11 = vsel %vm62_vm0, %v48_v8, 0.0  ;;  %v57_v12 = vcombine.high %v55_v9, %v55_v9  ;;  %v66_v14 = vsel %vm62_vm0, %v55_v9, 0.0  ;;  %p281_p6 = pnand %p280_p5, %p274_p2 }
  0x2f   :  { %v186_v58 = vcombine.low %v180_v51, %v184_v52  ;;  %v193_v2 = vrot.slane %v185_v57, %v350_v5 }
  0x30   :  { %v64_v13 = vsel %vm62_vm0, %v56_v10, 0.0  ;;  %v68_v16 = vsel %vm62_vm0, %v57_v12, 0.0 }
  0x31   :  { %v65_v15 = vadd.f32 %v64_v13, %v63_v11  ;;  %v200_v3 = vrot.slane %v186_v58, %v350_v5 }
  0x33   :  { %v67_v17 = vadd.f32 %v66_v14, %v65_v15  ;;  %v201_v8 = vcombine.low %v193_v2, %v200_v3 }
  0x35   :  { %v69_v18 = vadd.f32 %v68_v16, %v67_v17 }
  0x37   :  { %70 = vadd.xlane.f32.xlu0 %v69_v18 }
  0xc4   :  { %v71_v23 = vpop.xlane.xlu0 %70 }
  0xc5   :  { %v72_v24 = vmul.f32 0.001953125, %v71_v23 }
  0xc7   :  { %v80_v25 = vrot.slane %v72_v24, %v79_v22 }
  0xc9   :  { %v82_v26 = vsub.f32 %v39_v6, %v80_v25 }
  0xcb   :  { %v83_v27 = vmul.f32 %v82_v26, %v82_v26 }
  0xcd   :  { %v85_v28 = vcombine.high %v83_v27, %v83_v27  ;;  %v92_v29 = vrot.slane %v83_v27, %v350_v5 }
  0xcf   :  { %v99_v30 = vrot.slane %v85_v28, %v350_v5  ;;  %v100_v31 = vcombine.high %v92_v29, %v92_v29  ;;  %v106_v33 = vsel %vm62_vm0, %v92_v29, 0.0 }
  0xd1   :  { %v101_v32 = vcombine.high %v99_v30, %v99_v30  ;;  %v107_v34 = vsel %vm62_vm0, %v100_v31, 0.0  ;;  %v109_v36 = vsel %vm62_vm0, %v99_v30, 0.0 }
  0xd2   :  { %v108_v35 = vadd.f32 %v107_v34, %v106_v33 }
  0xd3   :  { %v111_v38 = vsel %vm62_vm0, %v101_v32, 0.0 }
  0xd4   :  { %v110_v37 = vadd.f32 %v109_v36, %v108_v35 }
  0xd6   :  { %v112_v39 = vadd.f32 %v111_v38, %v110_v37 }
  0xd8   :  { %113 = vadd.xlane.f32.xlu0 %v112_v39 }
 0x165   :  { %v114_v40 = vpop.xlane.xlu0 %113 }
 0x166   :  { %v115_v41 = vmul.f32 0.001953125, %v114_v40 }
 0x168   :  { %v116_v42 = vadd.f32 1e-05, %v115_v41 }
 0x16a   :  { %227 = vrsqrt.f32 %v116_v42 }
 0x174   :  { %v228_v59 = vpop.eup %227 }
 0x175   :  { %v141_v60 = vmul.f32 %v228_v59, %v124_v53  ;;  %v142_v61 = vmul.f32 %v228_v59, %v128_v54  ;;  %v143_v62 = vmul.f32 %v228_v59, %v132_v55  ;;  %v144_v63 = vmul.f32 %v228_v59, %v136_v56 }
 0x177   :  { %v149_v0 = vcombine.low %v141_v60, %v142_v61  ;;  %v150_v1 = vcombine.low %v143_v62, %v144_v63 }
 0x179   :  { %v157_v4 = vrot.slane %v149_v0, %v350_v5  ;;  %v164_v6 = vrot.slane %v150_v1, %v350_v5 }
 0x17b   :  { %v165_v7 = vcombine.low %v157_v4, %v164_v6 }
 0x17d   :  { %v167_v9 = vmul.f32 %v165_v7, %v82_v26 }
 0x17f   :  { %v203_v10 = vadd.f32 %v201_v8, %v167_v9 }
 0x181   :  { %204 = vst [vmem:[#allocation7] sm:$0xff] %v203_v10 }
 0x182   :  { %284 = shalt.err (!%p281_p6)
}
 0x183   :  { %s285_s13 = scalar_lea.hbm %s386_s3, 128 }
 0x184   :  { %p286_p7 = scmp.ne.s32.totalorder %s386_s3, %s285_s13  ;;  %p289_p8 = scmp.lt.u32.totalorder %s285_s13, %s386_s3 }
 0x186   :  { %p291_p9 = pnand %p289_p8, %p286_p7 }
 0x188   :  { %294 = shalt.err (!%p291_p9)
}
 0x189   :  { %214 = dma.vmem_to_hbm [thread:$0]  %s212_s9, 128, %s386_s3, [#allocation4]  }
 0x18a   :  { %299 = dma.done.wait [#allocation4], 128  }
 0x18b   :  { %300 = vsyncadd [#allocation4], 4294967168 }
 0x18c   :  { %218 = vsyncpa [#allocation3], 1 }
 0x18d   :  { %219 = vsyncpa [#allocation6], 1 }
 0x18e   :  { %220 = vsyncpa [#allocation4], 1 }

</bundles_post_ra>
